<compile_context>
chip_gen: v7x
topology: tpu7x:2x2x1
jax: 0.10.0
libtpu: 0.0.40
codegen_flags: <defaults>
</compile_context>

<pallas_src>
import functools

import jax
import jax.numpy as jnp
from jax import lax
from jax.experimental import pallas as pl
from jax.experimental.pallas import tpu as pltpu


def _residual_block_kernel(x_ref, w1_ref, b1_ref, w2_ref, b2_ref, o_ref,
                           pad0_ref, pad1_ref, stage_ref, y_ref,
                           *, H, W, HWp, PAD):
    """Processes NB images per grid step.

    x_ref   : (NB, CP, HWp)      inputs, channels padded to CP, spatial to HWp
    w1_ref  : (CP, 9*CP)         conv1 weights (BN1 folded), tap-major columns
    b1_ref  : (CP, 1)            folded conv1+BN1 bias
    w2_ref  : (CP, 9*CP)         conv2 weights (BN2 folded)
    b2_ref  : (CP, 1)            folded conv2+BN2 bias
    o_ref   : (NB, CP, HWp)      output
    pad0/1  : (CP, HWp + 2*PAD)  ping-pong zero-halo shift buffers
    stage   : (9*CP, NB*HWp)     fused-tap operand for one K=9*CP MXU dot
    y_ref   : (CP, NB*HWp)       inter-conv activation buffer
    """
    NB, CP, _ = x_ref.shape
    pbufs = (pad0_ref, pad1_ref)

    # Zero only the halo lanes; the interior is fully overwritten before every
    # read.  Done every grid step (cheap, aligned 128-lane stores) so that a
    # megacore-sharded grid on v7x never reads a stale halo.
    zero_halo = jnp.zeros((CP, PAD), jnp.float32)
    for pbuf in pbufs:
        pbuf[:, pl.ds(0, PAD)] = zero_halo
        pbuf[:, pl.ds(PAD + HWp, PAD)] = zero_halo

    # Column masks (hoisted out of the image loops) kill the row-wrap of the
    # horizontal taps dx = +/-1.
    col = lax.broadcasted_iota(jnp.int32, (CP, HWp), 1) % W
    left_ok = col >= 1        # valid positions for tap dx = -1
    right_ok = col <= W - 2   # valid positions for tap dx = +1
    taps = [(dy, dx) for dy in (-1, 0, 1) for dx in (-1, 0, 1)]

    def fill_stage(b, img):
        # Stage the 9 shifted/masked copies of image b into its stage columns.
        pbuf = pbufs[b % 2]                 # ping-pong breaks WAR across images
        pbuf[:, pl.ds(PAD, HWp)] = img      # lane-aligned unmasked store
        for t, (dy, dx) in enumerate(taps):
            xs = pbuf[:, pl.ds(PAD + dy * W + dx, HWp)]   # zero halo = conv pad
            if dx == -1:
                xs = jnp.where(left_ok, xs, 0.0)
            elif dx == 1:
                xs = jnp.where(right_ok, xs, 0.0)
            stage_ref[pl.ds(t * CP, CP), pl.ds(b * HWp, HWp)] = xs

    # --- conv1 + BN1 (folded) + ReLU: one fused K=9*CP dot over all NB images.
    for b in range(NB):
        fill_stage(b, x_ref[b])
    y1 = jnp.dot(w1_ref[...], stage_ref[...],
                 preferred_element_type=jnp.float32) + b1_ref[...]
    y1 = jnp.maximum(y1, 0.0)
    if HWp != H * W:
        # Keep the spatial-padding lanes at zero so conv2's vertical taps see
        # exact zero padding below the last image row.
        pos = lax.broadcasted_iota(jnp.int32, (CP, NB * HWp), 1) % HWp
        y1 = jnp.where(pos < H * W, y1, 0.0)
    y_ref[...] = y1

    # --- conv2 + BN2 (folded): restage y1 (per-image zero halos), one fused dot.
    for b in range(NB):
        fill_stage(b, y_ref[:, pl.ds(b * HWp, HWp)])
    y_ref[...] = jnp.dot(w2_ref[...], stage_ref[...],
                         preferred_element_type=jnp.float32) + b2_ref[...]

    # --- residual add (re-sliced at its use site) + final ReLU.
    for b in range(NB):
        o_ref[b] = jnp.maximum(y_ref[:, pl.ds(b * HWp, HWp)] + x_ref[b], 0.0)


@functools.partial(jax.jit, static_argnames=("eps", "images_per_step"))
def residual_block(x, w1, b1, g1, be1, m1, v1, w2, b2, g2, be2, m2, v2,
                   eps=1e-5, images_per_step=8):
    """x: (N, C, H, W) float32. Conv weights in PyTorch OIHW layout."""
    N, C, H, W = x.shape
    Cout = w1.shape[0]
    if Cout != C:
        raise NotImplementedError("residual path requires in_channels == out_channels")

    HW = H * W
    HWp = ((HW + 127) // 128) * 128          # lane-dense last dim
    PAD = ((W + 1 + 127) // 128) * 128       # 128-aligned halo offset
    CP = ((C + 7) // 8) * 8                  # sublane-aligned channel count

    # Fold BN (running stats) into the convs: BN(conv(x)+b) = conv(x; s*W) + bias.
    s1 = g1 / jnp.sqrt(v1 + eps)
    s2 = g2 / jnp.sqrt(v2 + eps)
    w1e = w1 * s1[:, None, None, None]
    w2e = w2 * s2[:, None, None, None]

    def pack_weights(w):  # OIHW -> (CP, 9*CP), tap-major columns (t*CP + c)
        co, ci = w.shape[0], w.shape[1]
        wt = jnp.transpose(w, (0, 2, 3, 1))                         # (O, ky, kx, I)
        wt = jnp.pad(wt, ((0, CP - co), (0, 0), (0, 0), (0, CP - ci)))
        return wt.reshape(CP, 9 * CP).astype(jnp.float32)

    def pack_bias(b, g_, be_, m_, s_):
        bias = (b - m_) * s_ + be_
        return jnp.pad(bias, (0, CP - bias.shape[0])).reshape(CP, 1).astype(jnp.float32)

    w1k = pack_weights(w1e)
    w2k = pack_weights(w2e)
    b1e = pack_bias(b1, g1, be1, m1, s1)
    b2e = pack_bias(b2, g2, be2, m2, s2)

    xf = x.reshape(N, C, HW).astype(jnp.float32)
    if CP != C or HWp != HW:
        xf = jnp.pad(xf, ((0, 0), (0, CP - C), (0, HWp - HW)))

    # >= 2 grid steps whenever N >= 2 so the "parallel" batch axis can shard
    # across both v7x TensorCores and input/output DMA overlaps compute.
    nb = max(1, min(images_per_step, N // 2 if N >= 2 else 1))
    while N % nb:
        nb -= 1
    grid = (N // nb,)

    # Explicit VMEM budget (double-buffered blocks + scratch), well under 64 MiB.
    elt = 4
    blk_bytes = 2 * 2 * nb * CP * HWp * elt
    w_bytes = 2 * (2 * CP * 9 * CP + 2 * CP) * elt
    scr_bytes = (2 * CP * (HWp + 2 * PAD) + 9 * CP * nb * HWp + CP * nb * HWp) * elt
    vmem_limit = int(min(max(2 * (blk_bytes + w_bytes + scr_bytes),
                             32 * 1024 * 1024), 48 * 1024 * 1024))

    kernel = functools.partial(_residual_block_kernel, H=H, W=W, HWp=HWp, PAD=PAD)

    out_flat = pl.pallas_call(
        kernel,
        out_shape=jax.ShapeDtypeStruct((N, CP, HWp), jnp.float32),
        grid_spec=pltpu.PrefetchScalarGridSpec(
            num_scalar_prefetch=0,
            grid=grid,
            in_specs=[
                pl.BlockSpec((nb, CP, HWp), lambda i: (i, 0, 0)),     # x
                pl.BlockSpec((CP, 9 * CP), lambda i: (0, 0)),         # w1 (VMEM)
                pl.BlockSpec((CP, 1), lambda i: (0, 0)),              # b1
                pl.BlockSpec((CP, 9 * CP), lambda i: (0, 0)),         # w2 (VMEM)
                pl.BlockSpec((CP, 1), lambda i: (0, 0)),              # b2
            ],
            out_specs=pl.BlockSpec((nb, CP, HWp), lambda i: (i, 0, 0)),
            scratch_shapes=[
                pltpu.VMEM((CP, HWp + 2 * PAD), jnp.float32),   # shift buffer (ping)
                pltpu.VMEM((CP, HWp + 2 * PAD), jnp.float32),   # shift buffer (pong)
                pltpu.VMEM((9 * CP, nb * HWp), jnp.float32),    # fused-tap stage
                pltpu.VMEM((CP, nb * HWp), jnp.float32),        # inter-conv buffer
            ]),
        compiler_params=pltpu.CompilerParams(
            dimension_semantics=("parallel",),
            vmem_limit_bytes=vmem_limit),
    )(xf, w1k, b1e, w2k, b2e)

    out_flat = out_flat[:, :Cout, :HW]
    return out_flat.reshape(N, Cout, H, W)


def reference_residual_block(x, w1, b1, g1, be1, m1, v1,
                             w2, b2, g2, be2, m2, v2, eps=1e-5):
    """Pure-JAX reference mirroring the PyTorch forward (BN in eval mode)."""
    def conv_bn(h, w, b, g, be, m, v):
        y = lax.conv_general_dilated(
            h, w, window_strides=(1, 1), padding=((1, 1), (1, 1)),
            dimension_numbers=("NCHW", "OIHW", "NCHW"))
        y = y + b[None, :, None, None]
        return ((y - m[None, :, None, None]) /
                jnp.sqrt(v[None, :, None, None] + eps) * g[None, :, None, None]
                + be[None, :, None, None])

    out = jax.nn.relu(conv_bn(x, w1, b1, g1, be1, m1, v1))
    out = conv_bn(out, w2, b2, g2, be2, m2, v2)
    return jax.nn.relu(out + x)


if __name__ == "__main__":
    N, C, H, W = 2, 4, 16, 16       # in_channels == out_channels, stride=1
    Cout = C

    key = jax.random.PRNGKey(0)
    ks = jax.random.split(key, 13)
    f32 = jnp.float32

    x = jax.random.normal(ks[0], (N, C, H, W), f32)

    w1 = 0.1 * jax.random.normal(ks[1], (Cout, C, 3, 3), f32)    # OIHW
    b1 = 0.1 * jax.random.normal(ks[2], (Cout,), f32)
    g1 = 1.0 + 0.1 * jax.random.normal(ks[3], (Cout,), f32)
    be1 = 0.1 * jax.random.normal(ks[4], (Cout,), f32)
    m1 = 0.1 * jax.random.normal(ks[5], (Cout,), f32)
    v1 = 1.0 + 0.1 * jnp.abs(jax.random.normal(ks[6], (Cout,), f32))

    w2 = 0.1 * jax.random.normal(ks[7], (Cout, Cout, 3, 3), f32)  # OIHW
    b2 = 0.1 * jax.random.normal(ks[8], (Cout,), f32)
    g2 = 1.0 + 0.1 * jax.random.normal(ks[9], (Cout,), f32)
    be2 = 0.1 * jax.random.normal(ks[10], (Cout,), f32)
    m2 = 0.1 * jax.random.normal(ks[11], (Cout,), f32)
    v2 = 1.0 + 0.1 * jnp.abs(jax.random.normal(ks[12], (Cout,), f32))

    params = (w1, b1, g1, be1, m1, v1, w2, b2, g2, be2, m2, v2)

    out = residual_block(x, *params)
    out = jax.block_until_ready(out)

    ref = reference_residual_block(x, *params)
    ref = jax.block_until_ready(ref)

    assert out.shape == (N, Cout, H, W)
    assert jnp.allclose(out, ref, atol=1e-4, rtol=1e-4), (
        f"max abs err = {jnp.max(jnp.abs(out - ref))}")

    print("KERNEL_OK")
</pallas_src>

<mosaic_0001>
module attributes {stable_mosaic.version = 11 : i64} {
  func.func @_residual_block_kernel(%arg0: i32, %arg1: memref<1x8x256xf32, #tpu.memory_space<vmem>>, %arg2: memref<8x72xf32, #tpu.memory_space<vmem>>, %arg3: memref<8x1xf32, #tpu.memory_space<vmem>>, %arg4: memref<8x72xf32, #tpu.memory_space<vmem>>, %arg5: memref<8x1xf32, #tpu.memory_space<vmem>>, %arg6: memref<1x8x256xf32, #tpu.memory_space<vmem>>, %arg7: memref<8x512xf32, #tpu.memory_space<vmem>>, %arg8: memref<8x512xf32, #tpu.memory_space<vmem>>, %arg9: memref<72x256xf32, #tpu.memory_space<vmem>>, %arg10: memref<8x256xf32, #tpu.memory_space<vmem>>) attributes {dimension_semantics = [#tpu.dimension_semantics<parallel>], iteration_bounds = array<i64: 2>, scalar_prefetch = 0 : i64, scratch_operands = 4 : i64, tpu.core_type = #tpu.core_type<tc>, window_params = [{transform_indices = @transform_0, window_bounds = array<i64: 1, 8, 256>}, {pipeline_mode = #tpu.pipeline_mode<synchronous>, transform_indices = @transform_1, window_bounds = array<i64: 8, 72>}, {pipeline_mode = #tpu.pipeline_mode<synchronous>, transform_indices = @transform_2, window_bounds = array<i64: 8, 1>}, {pipeline_mode = #tpu.pipeline_mode<synchronous>, transform_indices = @transform_3, window_bounds = array<i64: 8, 72>}, {pipeline_mode = #tpu.pipeline_mode<synchronous>, transform_indices = @transform_4, window_bounds = array<i64: 8, 1>}, {transform_indices = @transform_5, window_bounds = array<i64: 1, 8, 256>}]} {
    %cst = arith.constant 0.000000e+00 : f32
    %0 = vector.broadcast %cst : f32 to vector<8x128xf32>
    %c0 = arith.constant 0 : index
    %c0_0 = arith.constant 0 : index
    %1 = vector.load %arg7[%c0, %c0_0] : memref<8x512xf32, #tpu.memory_space<vmem>>, vector<8x128xf32>
    tpu.vector_store %arg7[%c0, %c0_0], %0 {strides = array<i32>} : memref<8x512xf32, #tpu.memory_space<vmem>>, vector<8x128xf32>,
    %c0_1 = arith.constant 0 : index
    %c384 = arith.constant 384 : index
    %2 = vector.load %arg7[%c0_1, %c384] : memref<8x512xf32, #tpu.memory_space<vmem>>, vector<8x128xf32>
    tpu.vector_store %arg7[%c0_1, %c384], %0 {strides = array<i32>} : memref<8x512xf32, #tpu.memory_space<vmem>>, vector<8x128xf32>,
    %c0_2 = arith.constant 0 : index
    %c0_3 = arith.constant 0 : index
    %3 = vector.load %arg8[%c0_2, %c0_3] : memref<8x512xf32, #tpu.memory_space<vmem>>, vector<8x128xf32>
    tpu.vector_store %arg8[%c0_2, %c0_3], %0 {strides = array<i32>} : memref<8x512xf32, #tpu.memory_space<vmem>>, vector<8x128xf32>,
    %c0_4 = arith.constant 0 : index
    %c384_5 = arith.constant 384 : index
    %4 = vector.load %arg8[%c0_4, %c384_5] : memref<8x512xf32, #tpu.memory_space<vmem>>, vector<8x128xf32>
    tpu.vector_store %arg8[%c0_4, %c384_5], %0 {strides = array<i32>} : memref<8x512xf32, #tpu.memory_space<vmem>>, vector<8x128xf32>,
    %5 = tpu.iota {dimensions = array<i32: 1>} : vector<8x256xi32>
    %c16_i32 = arith.constant 16 : i32
    %c0_i32 = arith.constant 0 : i32
    %6 = arith.cmpi eq, %c16_i32, %c0_i32 : i32
    %c1_i32 = arith.constant 1 : i32
    %7 = arith.select %6, %c1_i32, %c16_i32 : i32
    %8 = vector.broadcast %7 : i32 to vector<8x256xi32>
    %9 = arith.remsi %5, %8 : vector<8x256xi32>
    %c0_i32_6 = arith.constant 0 : i32
    %10 = vector.broadcast %c0_i32_6 : i32 to vector<8x256xi32>
    %11 = arith.cmpi ne, %9, %10 : vector<8x256xi32>
    %c0_i32_7 = arith.constant 0 : i32
    %12 = vector.broadcast %c0_i32_7 : i32 to vector<8x256xi32>
    %13 = arith.cmpi slt, %9, %12 : vector<8x256xi32>
    %c0_i32_8 = arith.constant 0 : i32
    %14 = arith.cmpi slt, %7, %c0_i32_8 : i32
    %15 = vector.broadcast %14 : i1 to vector<8x256xi1>
    %16 = vector.broadcast %15 : vector<8x256xi1> to vector<8x256xi1>
    %17 = arith.xori %13, %16 : vector<8x256xi1>
    %18 = arith.andi %17, %11 : vector<8x256xi1>
    %19 = vector.broadcast %7 : i32 to vector<8x256xi32>
    %20 = arith.addi %9, %19 : vector<8x256xi32>
    %21 = arith.select %18, %20, %9 : vector<8x256xi1>, vector<8x256xi32>
    %c1_i32_9 = arith.constant 1 : i32
    %22 = vector.broadcast %c1_i32_9 : i32 to vector<8x256xi32>
    %23 = arith.cmpi sge, %21, %22 : vector<8x256xi32>
    %c14_i32 = arith.constant 14 : i32
    %24 = vector.broadcast %c14_i32 : i32 to vector<8x256xi32>
    %25 = arith.cmpi sle, %21, %24 : vector<8x256xi32>
    %c0_10 = arith.constant 0 : index
    %c0_11 = arith.constant 0 : index
    %c0_12 = arith.constant 0 : index
    %26 = vector.load %arg1[%c0_10, %c0_11, %c0_12] : memref<1x8x256xf32, #tpu.memory_space<vmem>>, vector<1x8x256xf32>
    %27 = vector.shape_cast %26 : vector<1x8x256xf32> to vector<8x256xf32>
    %c0_13 = arith.constant 0 : index
    %c128 = arith.constant 128 : index
    %28 = vector.load %arg7[%c0_13, %c128] : memref<8x512xf32, #tpu.memory_space<vmem>>, vector<8x256xf32>
    tpu.vector_store %arg7[%c0_13, %c128], %27 {strides = array<i32>} : memref<8x512xf32, #tpu.memory_space<vmem>>, vector<8x256xf32>,
    %c0_14 = arith.constant 0 : index
    %c111 = arith.constant 111 : index
    %29 = vector.load %arg7[%c0_14, %c111] : memref<8x512xf32, #tpu.memory_space<vmem>>, vector<8x256xf32>
    %cst_15 = arith.constant 0.000000e+00 : f32
    %30 = vector.broadcast %cst_15 : f32 to vector<8x256xf32>
    %31 = arith.select %23, %29, %30 : vector<8x256xi1>, vector<8x256xf32>
    %c0_16 = arith.constant 0 : index
    %c0_17 = arith.constant 0 : index
    %32 = vector.load %arg9[%c0_16, %c0_17] : memref<72x256xf32, #tpu.memory_space<vmem>>, vector<8x256xf32>
    tpu.vector_store %arg9[%c0_16, %c0_17], %31 {strides = array<i32>} : memref<72x256xf32, #tpu.memory_space<vmem>>, vector<8x256xf32>,
    %c0_18 = arith.constant 0 : index
    %c112 = arith.constant 112 : index
    %33 = vector.load %arg7[%c0_18, %c112] : memref<8x512xf32, #tpu.memory_space<vmem>>, vector<8x256xf32>
    %c8 = arith.constant 8 : index
    %c0_19 = arith.constant 0 : index
    %34 = vector.load %arg9[%c8, %c0_19] : memref<72x256xf32, #tpu.memory_space<vmem>>, vector<8x256xf32>
    tpu.vector_store %arg9[%c8, %c0_19], %33 {strides = array<i32>} : memref<72x256xf32, #tpu.memory_space<vmem>>, vector<8x256xf32>,
    %c0_20 = arith.constant 0 : index
    %c113 = arith.constant 113 : index
    %35 = vector.load %arg7[%c0_20, %c113] : memref<8x512xf32, #tpu.memory_space<vmem>>, vector<8x256xf32>
    %cst_21 = arith.constant 0.000000e+00 : f32
    %36 = vector.broadcast %cst_21 : f32 to vector<8x256xf32>
    %37 = arith.select %25, %35, %36 : vector<8x256xi1>, vector<8x256xf32>
    %c16 = arith.constant 16 : index
    %c0_22 = arith.constant 0 : index
    %38 = vector.load %arg9[%c16, %c0_22] : memref<72x256xf32, #tpu.memory_space<vmem>>, vector<8x256xf32>
    tpu.vector_store %arg9[%c16, %c0_22], %37 {strides = array<i32>} : memref<72x256xf32, #tpu.memory_space<vmem>>, vector<8x256xf32>,
    %c0_23 = arith.constant 0 : index
    %c127 = arith.constant 127 : index
    %39 = vector.load %arg7[%c0_23, %c127] : memref<8x512xf32, #tpu.memory_space<vmem>>, vector<8x256xf32>
    %cst_24 = arith.constant 0.000000e+00 : f32
    %40 = vector.broadcast %cst_24 : f32 to vector<8x256xf32>
    %41 = arith.select %23, %39, %40 : vector<8x256xi1>, vector<8x256xf32>
    %c24 = arith.constant 24 : index
    %c0_25 = arith.constant 0 : index
    %42 = vector.load %arg9[%c24, %c0_25] : memref<72x256xf32, #tpu.memory_space<vmem>>, vector<8x256xf32>
    tpu.vector_store %arg9[%c24, %c0_25], %41 {strides = array<i32>} : memref<72x256xf32, #tpu.memory_space<vmem>>, vector<8x256xf32>,
    %c0_26 = arith.constant 0 : index
    %c128_27 = arith.constant 128 : index
    %43 = vector.load %arg7[%c0_26, %c128_27] : memref<8x512xf32, #tpu.memory_space<vmem>>, vector<8x256xf32>
    %c32 = arith.constant 32 : index
    %c0_28 = arith.constant 0 : index
    %44 = vector.load %arg9[%c32, %c0_28] : memref<72x256xf32, #tpu.memory_space<vmem>>, vector<8x256xf32>
    tpu.vector_store %arg9[%c32, %c0_28], %43 {strides = array<i32>} : memref<72x256xf32, #tpu.memory_space<vmem>>, vector<8x256xf32>,
    %c0_29 = arith.constant 0 : index
    %c129 = arith.constant 129 : index
    %45 = vector.load %arg7[%c0_29, %c129] : memref<8x512xf32, #tpu.memory_space<vmem>>, vector<8x256xf32>
    %cst_30 = arith.constant 0.000000e+00 : f32
    %46 = vector.broadcast %cst_30 : f32 to vector<8x256xf32>
    %47 = arith.select %25, %45, %46 : vector<8x256xi1>, vector<8x256xf32>
    %c40 = arith.constant 40 : index
    %c0_31 = arith.constant 0 : index
    %48 = vector.load %arg9[%c40, %c0_31] : memref<72x256xf32, #tpu.memory_space<vmem>>, vector<8x256xf32>
    tpu.vector_store %arg9[%c40, %c0_31], %47 {strides = array<i32>} : memref<72x256xf32, #tpu.memory_space<vmem>>, vector<8x256xf32>,
    %c0_32 = arith.constant 0 : index
    %c143 = arith.constant 143 : index
    %49 = vector.load %arg7[%c0_32, %c143] : memref<8x512xf32, #tpu.memory_space<vmem>>, vector<8x256xf32>
    %cst_33 = arith.constant 0.000000e+00 : f32
    %50 = vector.broadcast %cst_33 : f32 to vector<8x256xf32>
    %51 = arith.select %23, %49, %50 : vector<8x256xi1>, vector<8x256xf32>
    %c48 = arith.constant 48 : index
    %c0_34 = arith.constant 0 : index
    %52 = vector.load %arg9[%c48, %c0_34] : memref<72x256xf32, #tpu.memory_space<vmem>>, vector<8x256xf32>
    tpu.vector_store %arg9[%c48, %c0_34], %51 {strides = array<i32>} : memref<72x256xf32, #tpu.memory_space<vmem>>, vector<8x256xf32>,
    %c0_35 = arith.constant 0 : index
    %c144 = arith.constant 144 : index
    %53 = vector.load %arg7[%c0_35, %c144] : memref<8x512xf32, #tpu.memory_space<vmem>>, vector<8x256xf32>
    %c56 = arith.constant 56 : index
    %c0_36 = arith.constant 0 : index
    %54 = vector.load %arg9[%c56, %c0_36] : memref<72x256xf32, #tpu.memory_space<vmem>>, vector<8x256xf32>
    tpu.vector_store %arg9[%c56, %c0_36], %53 {strides = array<i32>} : memref<72x256xf32, #tpu.memory_space<vmem>>, vector<8x256xf32>,
    %c0_37 = arith.constant 0 : index
    %c145 = arith.constant 145 : index
    %55 = vector.load %arg7[%c0_37, %c145] : memref<8x512xf32, #tpu.memory_space<vmem>>, vector<8x256xf32>
    %cst_38 = arith.constant 0.000000e+00 : f32
    %56 = vector.broadcast %cst_38 : f32 to vector<8x256xf32>
    %57 = arith.select %25, %55, %56 : vector<8x256xi1>, vector<8x256xf32>
    %c64 = arith.constant 64 : index
    %c0_39 = arith.constant 0 : index
    %58 = vector.load %arg9[%c64, %c0_39] : memref<72x256xf32, #tpu.memory_space<vmem>>, vector<8x256xf32>
    tpu.vector_store %arg9[%c64, %c0_39], %57 {strides = array<i32>} : memref<72x256xf32, #tpu.memory_space<vmem>>, vector<8x256xf32>,
    %c0_40 = arith.constant 0 : index
    %c0_41 = arith.constant 0 : index
    %59 = vector.load %arg2[%c0_40, %c0_41] : memref<8x72xf32, #tpu.memory_space<vmem>>, vector<8x72xf32>
    %c0_42 = arith.constant 0 : index
    %c0_43 = arith.constant 0 : index
    %60 = vector.load %arg9[%c0_42, %c0_43] : memref<72x256xf32, #tpu.memory_space<vmem>>, vector<72x256xf32>
    %cst_44 = arith.constant dense<0.000000e+00> : vector<8x256xf32>
    %61 = tpu.matmul %59, %60, %cst_44 {dimension_numbers = #tpu.dot_dimension_numbers<[1], [0], [0], [1], [0, 0, 1, 1], [], []>} : vector<8x72xf32>, vector<72x256xf32>, vector<8x256xf32> -> vector<8x256xf32>
    %c0_45 = arith.constant 0 : index
    %c0_46 = arith.constant 0 : index
    %62 = vector.load %arg3[%c0_45, %c0_46] : memref<8x1xf32, #tpu.memory_space<vmem>>, vector<8x1xf32>
    %63 = vector.broadcast %62 : vector<8x1xf32> to vector<8x256xf32>
    %64 = arith.addf %61, %63 : vector<8x256xf32>
    %cst_47 = arith.constant 0.000000e+00 : f32
    %65 = vector.broadcast %cst_47 : f32 to vector<8x256xf32>
    %66 = arith.maximumf %64, %65 : vector<8x256xf32>
    %c0_48 = arith.constant 0 : index
    %c0_49 = arith.constant 0 : index
    %67 = vector.load %arg10[%c0_48, %c0_49] : memref<8x256xf32, #tpu.memory_space<vmem>>, vector<8x256xf32>
    tpu.vector_store %arg10[%c0_48, %c0_49], %66 {strides = array<i32>} : memref<8x256xf32, #tpu.memory_space<vmem>>, vector<8x256xf32>,
    %c0_50 = arith.constant 0 : index
    %c0_51 = arith.constant 0 : index
    %68 = vector.load %arg10[%c0_50, %c0_51] : memref<8x256xf32, #tpu.memory_space<vmem>>, vector<8x256xf32>
    %c0_52 = arith.constant 0 : index
    %c128_53 = arith.constant 128 : index
    %69 = vector.load %arg7[%c0_52, %c128_53] : memref<8x512xf32, #tpu.memory_space<vmem>>, vector<8x256xf32>
    tpu.vector_store %arg7[%c0_52, %c128_53], %68 {strides = array<i32>} : memref<8x512xf32, #tpu.memory_space<vmem>>, vector<8x256xf32>,
    %c0_54 = arith.constant 0 : index
    %c111_55 = arith.constant 111 : index
    %70 = vector.load %arg7[%c0_54, %c111_55] : memref<8x512xf32, #tpu.memory_space<vmem>>, vector<8x256xf32>
    %cst_56 = arith.constant 0.000000e+00 : f32
    %71 = vector.broadcast %cst_56 : f32 to vector<8x256xf32>
    %72 = arith.select %23, %70, %71 : vector<8x256xi1>, vector<8x256xf32>
    %c0_57 = arith.constant 0 : index
    %c0_58 = arith.constant 0 : index
    %73 = vector.load %arg9[%c0_57, %c0_58] : memref<72x256xf32, #tpu.memory_space<vmem>>, vector<8x256xf32>
    tpu.vector_store %arg9[%c0_57, %c0_58], %72 {strides = array<i32>} : memref<72x256xf32, #tpu.memory_space<vmem>>, vector<8x256xf32>,
    %c0_59 = arith.constant 0 : index
    %c112_60 = arith.constant 112 : index
    %74 = vector.load %arg7[%c0_59, %c112_60] : memref<8x512xf32, #tpu.memory_space<vmem>>, vector<8x256xf32>
    %c8_61 = arith.constant 8 : index
    %c0_62 = arith.constant 0 : index
    %75 = vector.load %arg9[%c8_61, %c0_62] : memref<72x256xf32, #tpu.memory_space<vmem>>, vector<8x256xf32>
    tpu.vector_store %arg9[%c8_61, %c0_62], %74 {strides = array<i32>} : memref<72x256xf32, #tpu.memory_space<vmem>>, vector<8x256xf32>,
    %c0_63 = arith.constant 0 : index
    %c113_64 = arith.constant 113 : index
    %76 = vector.load %arg7[%c0_63, %c113_64] : memref<8x512xf32, #tpu.memory_space<vmem>>, vector<8x256xf32>
    %cst_65 = arith.constant 0.000000e+00 : f32
    %77 = vector.broadcast %cst_65 : f32 to vector<8x256xf32>
    %78 = arith.select %25, %76, %77 : vector<8x256xi1>, vector<8x256xf32>
    %c16_66 = arith.constant 16 : index
    %c0_67 = arith.constant 0 : index
    %79 = vector.load %arg9[%c16_66, %c0_67] : memref<72x256xf32, #tpu.memory_space<vmem>>, vector<8x256xf32>
    tpu.vector_store %arg9[%c16_66, %c0_67], %78 {strides = array<i32>} : memref<72x256xf32, #tpu.memory_space<vmem>>, vector<8x256xf32>,
    %c0_68 = arith.constant 0 : index
    %c127_69 = arith.constant 127 : index
    %80 = vector.load %arg7[%c0_68, %c127_69] : memref<8x512xf32, #tpu.memory_space<vmem>>, vector<8x256xf32>
    %cst_70 = arith.constant 0.000000e+00 : f32
    %81 = vector.broadcast %cst_70 : f32 to vector<8x256xf32>
    %82 = arith.select %23, %80, %81 : vector<8x256xi1>, vector<8x256xf32>
    %c24_71 = arith.constant 24 : index
    %c0_72 = arith.constant 0 : index
    %83 = vector.load %arg9[%c24_71, %c0_72] : memref<72x256xf32, #tpu.memory_space<vmem>>, vector<8x256xf32>
    tpu.vector_store %arg9[%c24_71, %c0_72], %82 {strides = array<i32>} : memref<72x256xf32, #tpu.memory_space<vmem>>, vector<8x256xf32>,
    %c0_73 = arith.constant 0 : index
    %c128_74 = arith.constant 128 : index
    %84 = vector.load %arg7[%c0_73, %c128_74] : memref<8x512xf32, #tpu.memory_space<vmem>>, vector<8x256xf32>
    %c32_75 = arith.constant 32 : index
    %c0_76 = arith.constant 0 : index
    %85 = vector.load %arg9[%c32_75, %c0_76] : memref<72x256xf32, #tpu.memory_space<vmem>>, vector<8x256xf32>
    tpu.vector_store %arg9[%c32_75, %c0_76], %84 {strides = array<i32>} : memref<72x256xf32, #tpu.memory_space<vmem>>, vector<8x256xf32>,
    %c0_77 = arith.constant 0 : index
    %c129_78 = arith.constant 129 : index
    %86 = vector.load %arg7[%c0_77, %c129_78] : memref<8x512xf32, #tpu.memory_space<vmem>>, vector<8x256xf32>
    %cst_79 = arith.constant 0.000000e+00 : f32
    %87 = vector.broadcast %cst_79 : f32 to vector<8x256xf32>
    %88 = arith.select %25, %86, %87 : vector<8x256xi1>, vector<8x256xf32>
    %c40_80 = arith.constant 40 : index
    %c0_81 = arith.constant 0 : index
    %89 = vector.load %arg9[%c40_80, %c0_81] : memref<72x256xf32, #tpu.memory_space<vmem>>, vector<8x256xf32>
    tpu.vector_store %arg9[%c40_80, %c0_81], %88 {strides = array<i32>} : memref<72x256xf32, #tpu.memory_space<vmem>>, vector<8x256xf32>,
    %c0_82 = arith.constant 0 : index
    %c143_83 = arith.constant 143 : index
    %90 = vector.load %arg7[%c0_82, %c143_83] : memref<8x512xf32, #tpu.memory_space<vmem>>, vector<8x256xf32>
    %cst_84 = arith.constant 0.000000e+00 : f32
    %91 = vector.broadcast %cst_84 : f32 to vector<8x256xf32>
    %92 = arith.select %23, %90, %91 : vector<8x256xi1>, vector<8x256xf32>
    %c48_85 = arith.constant 48 : index
    %c0_86 = arith.constant 0 : index
    %93 = vector.load %arg9[%c48_85, %c0_86] : memref<72x256xf32, #tpu.memory_space<vmem>>, vector<8x256xf32>
    tpu.vector_store %arg9[%c48_85, %c0_86], %92 {strides = array<i32>} : memref<72x256xf32, #tpu.memory_space<vmem>>, vector<8x256xf32>,
    %c0_87 = arith.constant 0 : index
    %c144_88 = arith.constant 144 : index
    %94 = vector.load %arg7[%c0_87, %c144_88] : memref<8x512xf32, #tpu.memory_space<vmem>>, vector<8x256xf32>
    %c56_89 = arith.constant 56 : index
    %c0_90 = arith.constant 0 : index
    %95 = vector.load %arg9[%c56_89, %c0_90] : memref<72x256xf32, #tpu.memory_space<vmem>>, vector<8x256xf32>
    tpu.vector_store %arg9[%c56_89, %c0_90], %94 {strides = array<i32>} : memref<72x256xf32, #tpu.memory_space<vmem>>, vector<8x256xf32>,
    %c0_91 = arith.constant 0 : index
    %c145_92 = arith.constant 145 : index
    %96 = vector.load %arg7[%c0_91, %c145_92] : memref<8x512xf32, #tpu.memory_space<vmem>>, vector<8x256xf32>
    %cst_93 = arith.constant 0.000000e+00 : f32
    %97 = vector.broadcast %cst_93 : f32 to vector<8x256xf32>
    %98 = arith.select %25, %96, %97 : vector<8x256xi1>, vector<8x256xf32>
    %c64_94 = arith.constant 64 : index
    %c0_95 = arith.constant 0 : index
    %99 = vector.load %arg9[%c64_94, %c0_95] : memref<72x256xf32, #tpu.memory_space<vmem>>, vector<8x256xf32>
    tpu.vector_store %arg9[%c64_94, %c0_95], %98 {strides = array<i32>} : memref<72x256xf32, #tpu.memory_space<vmem>>, vector<8x256xf32>,
    %c0_96 = arith.constant 0 : index
    %c0_97 = arith.constant 0 : index
    %100 = vector.load %arg4[%c0_96, %c0_97] : memref<8x72xf32, #tpu.memory_space<vmem>>, vector<8x72xf32>
    %c0_98 = arith.constant 0 : index
    %c0_99 = arith.constant 0 : index
    %101 = vector.load %arg9[%c0_98, %c0_99] : memref<72x256xf32, #tpu.memory_space<vmem>>, vector<72x256xf32>
    %cst_100 = arith.constant dense<0.000000e+00> : vector<8x256xf32>
    %102 = tpu.matmul %100, %101, %cst_100 {dimension_numbers = #tpu.dot_dimension_numbers<[1], [0], [0], [1], [0, 0, 1, 1], [], []>} : vector<8x72xf32>, vector<72x256xf32>, vector<8x256xf32> -> vector<8x256xf32>
    %c0_101 = arith.constant 0 : index
    %c0_102 = arith.constant 0 : index
    %103 = vector.load %arg5[%c0_101, %c0_102] : memref<8x1xf32, #tpu.memory_space<vmem>>, vector<8x1xf32>
    %104 = vector.broadcast %103 : vector<8x1xf32> to vector<8x256xf32>
    %105 = arith.addf %102, %104 : vector<8x256xf32>
    %c0_103 = arith.constant 0 : index
    %c0_104 = arith.constant 0 : index
    %106 = vector.load %arg10[%c0_103, %c0_104] : memref<8x256xf32, #tpu.memory_space<vmem>>, vector<8x256xf32>
    tpu.vector_store %arg10[%c0_103, %c0_104], %105 {strides = array<i32>} : memref<8x256xf32, #tpu.memory_space<vmem>>, vector<8x256xf32>,
    %c0_105 = arith.constant 0 : index
    %c0_106 = arith.constant 0 : index
    %107 = vector.load %arg10[%c0_105, %c0_106] : memref<8x256xf32, #tpu.memory_space<vmem>>, vector<8x256xf32>
    %c0_107 = arith.constant 0 : index
    %c0_108 = arith.constant 0 : index
    %c0_109 = arith.constant 0 : index
    %108 = vector.load %arg1[%c0_107, %c0_108, %c0_109] : memref<1x8x256xf32, #tpu.memory_space<vmem>>, vector<1x8x256xf32>
    %109 = vector.shape_cast %108 : vector<1x8x256xf32> to vector<8x256xf32>
    %110 = arith.addf %107, %109 : vector<8x256xf32>
    %cst_110 = arith.constant 0.000000e+00 : f32
    %111 = vector.broadcast %cst_110 : f32 to vector<8x256xf32>
    %112 = arith.maximumf %110, %111 : vector<8x256xf32>
    %c0_111 = arith.constant 0 : index
    %c0_112 = arith.constant 0 : index
    %c0_113 = arith.constant 0 : index
    %113 = vector.load %arg6[%c0_111, %c0_112, %c0_113] : memref<1x8x256xf32, #tpu.memory_space<vmem>>, vector<1x8x256xf32>
    %114 = vector.shape_cast %113 : vector<1x8x256xf32> to vector<8x256xf32>
    %115 = vector.shape_cast %112 : vector<8x256xf32> to vector<1x8x256xf32>
    tpu.vector_store %arg6[%c0_111, %c0_112, %c0_113], %115 {strides = array<i32>} : memref<1x8x256xf32, #tpu.memory_space<vmem>>, vector<1x8x256xf32>,
    return
  }
  func.func @transform_0(%arg0: i32) -> (i32, i32, i32) {
    %c0_i32 = arith.constant 0 : i32
    %c0_i32_0 = arith.constant 0 : i32
    %c0_i32_1 = arith.constant 0 : i32
    return %arg0, %c0_i32, %c0_i32_0 : i32, i32, i32
  }
  func.func @transform_1(%arg0: i32) -> (i32, i32) {
    %c0_i32 = arith.constant 0 : i32
    %c0_i32_0 = arith.constant 0 : i32
    %c0_i32_1 = arith.constant 0 : i32
    return %c0_i32, %c0_i32_0 : i32, i32
  }
  func.func @transform_2(%arg0: i32) -> (i32, i32) {
    %c0_i32 = arith.constant 0 : i32
    %c0_i32_0 = arith.constant 0 : i32
    %c0_i32_1 = arith.constant 0 : i32
    return %c0_i32, %c0_i32_0 : i32, i32
  }
  func.func @transform_3(%arg0: i32) -> (i32, i32) {
    %c0_i32 = arith.constant 0 : i32
    %c0_i32_0 = arith.constant 0 : i32
    %c0_i32_1 = arith.constant 0 : i32
    return %c0_i32, %c0_i32_0 : i32, i32
  }
  func.func @transform_4(%arg0: i32) -> (i32, i32) {
    %c0_i32 = arith.constant 0 : i32
    %c0_i32_0 = arith.constant 0 : i32
    %c0_i32_1 = arith.constant 0 : i32
    return %c0_i32, %c0_i32_0 : i32, i32
  }
  func.func @transform_5(%arg0: i32) -> (i32, i32, i32) {
    %c0_i32 = arith.constant 0 : i32
    %c0_i32_0 = arith.constant 0 : i32
    %c0_i32_1 = arith.constant 0 : i32
    return %arg0, %c0_i32, %c0_i32_0 : i32, i32, i32
  }
}

</mosaic_0001>

<bundles_post_ra>
// kernel: residual_block.1
= control target key start
LH: loop header
LB: loop body
LE: loop exit
PB: predicated region body
PF: predicated region fallthrough
CT: control target
= control target key end

     0   :  { %s1093_s18 = smov 0   ;;  %s1345_s0 = inlined_call_operand.vmem [shape: f32[2,8,256], index: 0, kind: input, shape index: {}]   ;;  %s1346_s1 = inlined_call_operand.vmem [shape: f32[8,72], index: 1, kind: input, shape index: {}]   ;;  %s1347_s2 = inlined_call_operand.vmem [shape: f32[8,1], index: 2, kind: input, shape index: {}]   ;;  %s1348_s3 = inlined_call_operand.vmem [shape: f32[8,72], index: 3, kind: input, shape index: {}]   ;;  %s1349_s4 = inlined_call_operand.vmem [shape: f32[8,1], index: 4, kind: input, shape index: {}]   ;;  %s1350_s5 = inlined_call_operand.vmem [shape: f32[2,8,256], index: 5, kind: output, shape index: {}]  }
   0x1 LB: > { %s866_s19 = sadd.s32 4294967295, %s1050_s18   ;;  %p870_p0 = scmp.ge.s32.totalorder %s1050_s18, 1  ;;  %s1050_s18 = sphi %s1093_s18, %s15_s18  }
   0x2   : > { %p187_p1 = scmp.lt.s32.totalorder %s1050_s18, 3 }
   0x4   : > { %p188_p2 = pnand %p870_p0, %p187_p1 }
   0x5   : > { %p215_p3 = scmp.lt.s32.totalorder (!%p188_p2), %s866_s19, 1  ;;  %v1052_v0 = vmov (!%p188_p2), 0.0   ;;  %s1053_s20 = smov (!%p188_p2), 17   ;;  %v451_v5 = vld [vmem:[%s1347_s2] sm:$0xff] (!%p188_p2)  ;;  %v1061_v6 = vmov (!%p188_p2), 0   ;;  %v229_v7 = vlaneseq (!%p188_p2)  ;;  %vm276_vm0 = vcmask (!%p188_p2), 138240  }
   0x6   : > { %191 = sbr.rel (%p188_p2) target bundleno = 749 (0x2ed), region = 40  ;;  %270 = vrot.lane.b32.xlu1 (!%p188_p2), %v1052_v0, %s1053_s20  ;;  %525 = vmatprep.mubr.f32.mxu0 (!%p188_p2), %v1052_v0  ;;  %s1054_s25 = smov (!%p188_p2), 16   ;;  %vm297_vm2 = vcmask (!%p188_p2), 130048   ;;  %vm337_vm4 = vcmask (!%p188_p2), 7168   ;;  %vm1062_vm5 = vmmov (!%p188_p2), 1   ;;  %vm316_vm8 = vcmask (!%p188_p2), 121856  }
   0x7   : > { %792 = vmatprep.mubr.f32.mxu1 (!%p188_p2), %v1052_v0  ;;  %s1055_s26 = smov (!%p188_p2), 1   ;;  %s1056_s27 = smov (!%p188_p2), 15   ;;  %1007 = vset.pattern.permute.xlu1 (!%p188_p2), %v1061_v6  ;;  %v230_v9 = vand.u32 (!%p188_p2), 127, %v229_v7  ;;  %vm1352_vm13 = vcmask (!%p188_p2), 1039360   ;;  %vm404_vm14 = vcmask (!%p188_p2), 916480  }
   0x8   : > { %s1057_s28 = smov (!%p188_p2), 127   ;;  %s1058_s29 = smov (!%p188_p2), 112   ;;  %1043 = vset.pattern.permute.xlu0 (!%p188_p2), %v1061_v6 }
   0x9   : > { %s1059_s30 = smov (!%p188_p2), 113   ;;  %s1060_s6 = smov (!%p188_p2), 111   ;;  %v231_v11 = vadd.s32 (!%p188_p2), 128, %v230_v9  ;;  %v236_v15 = vand.u32 (!%p188_p2), 15, %v230_v9 }
   0xa   : > { %291 = vrot.lane.b32.xlu1 (!%p188_p2), %v1052_v0, %s1054_s25 }
   0xb   : > { %v243_v14 = vand.u32 (!%p188_p2), 15, %v231_v11  ;;  %vm1161_vm3 = vcmp.ge.s32.totalorder (!%p188_p2), %v236_v15, 1  ;;  %vm1190_vm10 = vcmp.le.s32.totalorder (!%p188_p2), %v236_v15, 14 }
   0xc   : > { %vm1179_vm7 = vmpackc.low (!%p188_p2), %vm1062_vm5, %vm1161_vm3 }
   0xd   : > { %s1376_s19 = smov (!%p215_p3, %s866_s19), 1  ;;  %vm1157_vm1 = vcmp.ge.s32.totalorder %v243_v14, 1  ;;  %vm1183_vm9 = vcmp.le.s32.totalorder %v243_v14, 14  ;;  %vm1351_vm12 = vmpackc.low %vm1161_vm3, %vm1190_vm10 }
   0xe   : > { %s879_s21 = sshll.u32 %s1376_s19, 4  ;;  %vm1170_vm6 = vmpackc.low %vm1062_vm5, %vm1157_vm1 }
   0xf   : > { %s219_s24 = scalar_lea.vmem %s1345_s0, %s879_s21  ;;  %vm912_vm11 = vmpackc.low %vm1157_vm1, %vm1183_vm9  ;;  %vm1373_vm1 = vcmask 924672   ;;  %s224_s17 = scalar_lea.vmem %s1350_s5, %s879_s21 }
  0x10   : > { %v1115_v1 = vld [vmem:[%s219_s24] sm:$0xff]  ;;  %v1117_v2 = vld [vmem:[%s219_s24 + $0x8] sm:$0xff]  ;;  %vm1222_vm15 = vmpackc.low %vm1183_vm9, %vm1062_vm5 }
  0x11   : > { %v972_v3 = vpack.i.bf16 %v1117_v2, %v1115_v1  ;;  %v992_v4 = vpack.i.bf16 %v1052_v0, %v1117_v2 }
  0x13   : > { %973 = vrot.lane.b32.xlu0 %v972_v3, %s1053_s20  ;;  %988 = vrot.lane.b32.xlu1 %v972_v3, %s1055_s26 }
  0x17   : > { %978 = vrot.lane.b32.xlu0 %v972_v3, %s1054_s25  ;;  %331 = vrot.lane.b32.xlu1 %v1052_v0, %s1055_s26 }
  0x1b   : > { %983 = vrot.lane.b32.xlu0 %v972_v3, %s1056_s27  ;;  %356 = vrot.lane.b32.xlu1 %v1115_v1, %s1057_s28 }
  0x1f   : > { %310 = vrot.lane.b32.xlu0 %v1052_v0, %s1056_s27  ;;  %1003 = vrot.lane.b32.xlu1 %v992_v4, %s1058_s29 }
  0x23   : > { %993 = vrot.lane.b32.xlu0 %v992_v4, %s1057_s28  ;;  %398 = vrot.lane.b32.xlu1 %v1115_v1, %s1058_s29 }
  0x27   : > { %998 = vrot.lane.b32.xlu0 %v992_v4, %s1059_s30  ;;  %421 = vrot.lane.b32.xlu1 %v1052_v0, %s1060_s6 }
  0x2b   : > { %377 = vrot.lane.b32.xlu0 %v1115_v1, %s1059_s30  ;;  %454 = vperm.xlu1 %1007, %v451_v5  }
  0x2f   : > { %419 = vrot.lane.b32.xlu0 %v1117_v2, %s1060_s6  ;;  %566 = vrot.lane.b32.xlu1 %v1052_v0, %s1054_s25 }
  0x33   : > { %417 = vrot.lane.b32.xlu0 %v1115_v1, %s1060_s6  ;;  %604 = vrot.lane.b32.xlu1 %v1052_v0, %s1055_s26 }
  0x37   : > { %546 = vrot.lane.b32.xlu0 %v1052_v0, %s1053_s20 }
  0x3b   : > { %584 = vrot.lane.b32.xlu0 %v1052_v0, %s1056_s27 }
  0x78   : > { %v271_v8 = vpop.permute.xlu1 %270 }
  0x7c   : > { %v292_v10 = vpop.permute.xlu1 %291 }
  0x85   : > { %v974_v12 = vpop.permute.xlu0 %973  ;;  %v989_v13 = vpop.permute.xlu1 %988 }
  0x86   : > { %v976_v16 = vunpack.i.h.bf16 %v974_v12  ;;  %v975_v17 = vunpack.i.l.bf16 %v974_v12  ;;  %v991_v24 = vunpack.i.h.bf16 %v989_v13  ;;  %v990_v25 = vunpack.i.l.bf16 %v989_v13  ;;  %v432_v13 = vld [vmem:[%s1346_s1] sm:$0xff] }
  0x88   : > { %v278_v26 = vsel %vm276_vm0, %v975_v17, %v976_v16  ;;  %v277_v29 = vsel %vm276_vm0, %v271_v8, %v975_v17  ;;  %v339_v39 = vsel %vm337_vm4, %v990_v25, %v991_v24 }
  0x89   : > { %v979_v18 = vpop.permute.xlu0 %978  ;;  %v332_v21 = vpop.permute.xlu1 %331 }
  0x8a   : > { %v981_v22 = vunpack.i.h.bf16 %v979_v18  ;;  %v980_v23 = vunpack.i.l.bf16 %v979_v18  ;;  %v338_v41 = vsel %vm337_vm4, %v332_v21, %v990_v25 }
  0x8c   : > { %v299_v27 = vsel %vm297_vm2, %v980_v23, %v981_v22  ;;  %v298_v30 = vsel %vm297_vm2, %v292_v10, %v980_v23 }
  0x8d   : > { %v984_v31 = vpop.permute.xlu0 %983  ;;  %v905_v32 = vpack.c.bf16 %v299_v27, %v278_v26  ;;  %v908_v33 = vpack.c.bf16 %v298_v30, %v277_v29  ;;  %v357_v36 = vpop.permute.xlu1 %356  ;;  %v719_v26 = vld [vmem:[%s1349_s4] sm:$0xff] }
  0x8e   : > { %v986_v37 = vunpack.i.h.bf16 %v984_v31  ;;  %v985_v38 = vunpack.i.l.bf16 %v984_v31 }
  0x8f   : > { %907 = vmatprep.subr.msk.bf16.mxu0 %vm1170_vm6, %v905_v32 }
  0x90   : > { %910 = vmatpush1.bf16.msk.msra.mxu0 %vm1179_vm7, %v908_v33  ;;  %v318_v42 = vsel %vm316_vm8, %v985_v38, %v986_v37 }
  0x91   : > { %v311_v43 = vpop.permute.xlu0 %310  ;;  %v911_v44 = vpack.c.bf16 %v339_v39, %v318_v42  ;;  %v1004_v47 = vpop.permute.xlu1 %1003 }
  0x92   : > { %v317_v45 = vsel %vm316_vm8, %v311_v43, %v985_v38  ;;  %v1006_v51 = vunpack.i.h.bf16 %v1004_v47  ;;  %v1005_v52 = vunpack.i.l.bf16 %v1004_v47 }
  0x93   : > { %v914_v46 = vpack.c.bf16 %v338_v41, %v317_v45  ;;  %913 = vmatprep.subr.msk.bf16.mxu0 %vm912_vm11, %v911_v44 }
  0x94   : > { %v406_v63 = vsel %vm404_vm14, %v1005_v52, %v1006_v51 }
  0x95   : > { %v994_v48 = vpop.permute.xlu0 %993  ;;  %916 = vmatpush1.bf16.msk.msra.mxu0 %vm1351_vm12, %v914_v46  ;;  %vm1231_vm12 = vmpackc.low %vm1190_vm10, %vm1062_vm5  ;;  %v399_v60 = vpop.permute.xlu1 %398  ;;  %vm423_vm5 = vcmask 908288  }
  0x96   : > { %v996_v49 = vunpack.i.h.bf16 %v994_v48  ;;  %v995_v50 = vunpack.i.l.bf16 %v994_v48  ;;  %v405_v3 = vsel %vm404_vm14, %v399_v60, %v1005_v52 }
  0x98   : > { %v363_v53 = vsel %vm1352_vm13, %v357_v36, %v995_v50  ;;  %v364_v54 = vsel %vm1352_vm13, %v995_v50, %v996_v49  ;;  %vm1353_vm13 = vcmask 924672  }
  0x99   : > { %v917_v56 = vpack.c.bf16 %v364_v54, %v1117_v2  ;;  %v920_v57 = vpack.c.bf16 %v363_v53, %v1115_v1  ;;  %v999_v58 = vpop.permute.xlu0 %998  ;;  %v422_v9 = vpop.permute.xlu1 %421 }
  0x9a   : > { %v1001_v61 = vunpack.i.h.bf16 %v999_v58  ;;  %v1000_v62 = vunpack.i.l.bf16 %v999_v58 }
  0x9b   : > { %919 = vmatprep.subr.msk.bf16.mxu0 %vm1222_vm15, %v917_v56 }
  0x9c   : > { %922 = vmatpush1.bf16.msk.msra.mxu0 %vm1231_vm12, %v920_v57  ;;  %v385_v4 = vsel %vm1353_vm13, %v1000_v62, %v1001_v61 }
  0x9d   : > { %v378_v5 = vpop.permute.xlu0 %377  ;;  %v923_v6 = vpack.c.bf16 %v406_v63, %v385_v4 }
  0x9e   : > { %v384_v7 = vsel %vm1353_vm13, %v378_v5, %v1000_v62  ;;  %vm457_vm13 = vcmask 588800  }
  0x9f   : > { %v926_v8 = vpack.c.bf16 %v405_v3, %v384_v7  ;;  %925 = vmatprep.subr.msk.bf16.mxu0 %vm1170_vm6, %v923_v6 }
  0xa1   : > { %v420_v10 = vpop.permute.xlu0 %419  ;;  %928 = vmatpush1.bf16.msk.msra.mxu0 %vm1179_vm7, %v926_v8 }
  0xa2   : > { %v425_v11 = vsel %vm423_vm5, %v420_v10, %v422_v9 }
  0xa3   : > { %891 = vmatprep.subr.msk.mxu0 %vm1183_vm9, %v425_v11 }
  0xa5   : > { %v418_v12 = vpop.permute.xlu0 %417 }
  0xa6   : > { %v424_v14 = vsel %vm423_vm5, %v418_v12, %v420_v10 }
  0xa7   : > { %892 = vmatpush1.msk.msra.mxu0 %vm1190_vm10, %v424_v14 }
  0xa8   : > { %875 = vmatmul.mubr.msk.f32.vlgmr.msra.gmra.mrb[0].mxu0 %vm457_vm13, %v432_v13 }
  0xa9   : > { %v547_v29 = vpop.permute.xlu0 %546 }
  0xaa   : > { %v455_v15 = vpop.permute.xlu1 %454 }
  0xad   : > { %v585_v31 = vpop.permute.xlu0 %584 }
  0xae   : > { %v567_v27 = vpop.permute.xlu1 %566 }
  0xb2   : > { %v605_v30 = vpop.permute.xlu1 %604 }
 0x17b   : > { %v527_v16 = vpop.f32.mrb[0].mxu0 }
 0x17c   : > { %v528_v17 = vadd.f32 %v527_v16, %v455_v15  ;;  %v529_v18 = vpop.f32.mrb[1].mxu0 }
 0x17d   : > { %v530_v21 = vadd.f32 %v529_v18, %v455_v15 }
 0x17e   : > { %v1257_v22 = vmax.f32 %v528_v17, 0.0 }
 0x17f   : > { %v1259_v23 = vmax.f32 %v530_v21, 0.0 }
 0x181   : > { %v1013_v24 = vpack.i.bf16 %v1259_v23, %v1257_v22  ;;  %v1038_v25 = vpack.i.bf16 %v1052_v0, %v1259_v23 }
 0x183   : > { %1014 = vrot.lane.b32.xlu1 %v1013_v24, %s1054_s25  ;;  %1009 = vrot.lane.b32.xlu0 %v1013_v24, %s1053_s20 }
 0x187   : > { %1024 = vrot.lane.b32.xlu1 %v1013_v24, %s1055_s26  ;;  %1019 = vrot.lane.b32.xlu0 %v1013_v24, %s1056_s27  ;;  %v700_v24 = vld [vmem:[%s1348_s3] sm:$0xff] }
 0x18b   : > { %628 = vrot.lane.b32.xlu1 %v1257_v22, %s1057_s28  ;;  %648 = vrot.lane.b32.xlu0 %v1257_v22, %s1059_s30 }
 0x18f   : > { %1039 = vrot.lane.b32.xlu1 %v1038_v25, %s1058_s29  ;;  %1029 = vrot.lane.b32.xlu0 %v1038_v25, %s1057_s28 }
 0x193   : > { %668 = vrot.lane.b32.xlu1 %v1257_v22, %s1058_s29  ;;  %1034 = vrot.lane.b32.xlu0 %v1038_v25, %s1059_s30 }
 0x197   : > { %690 = vrot.lane.b32.xlu1 %v1052_v0, %s1060_s6  ;;  %688 = vrot.lane.b32.xlu0 %v1259_v23, %s1060_s6 }
 0x19b   : > { %722 = vperm.xlu1 %1007, %v719_v26   ;;  %686 = vrot.lane.b32.xlu0 %v1257_v22, %s1060_s6 }
 0x1f5   : > { %v1015_v32 = vpop.permute.xlu1 %1014  ;;  %v1010_v33 = vpop.permute.xlu0 %1009 }
 0x1f6   : > { %v1017_v36 = vunpack.i.h.bf16 %v1015_v32  ;;  %v1016_v37 = vunpack.i.l.bf16 %v1015_v32  ;;  %v1012_v0 = vunpack.i.h.bf16 %v1010_v33  ;;  %v1011_v38 = vunpack.i.l.bf16 %v1010_v33 }
 0x1f8   : > { %v553_v39 = vsel %vm276_vm0, %v1011_v38, %v1012_v0  ;;  %v573_v41 = vsel %vm297_vm2, %v1016_v37, %v1017_v36  ;;  %v552_v42 = vsel %vm276_vm0, %v547_v29, %v1011_v38  ;;  %v572_v43 = vsel %vm297_vm2, %v567_v27, %v1016_v37  ;;  %vm1370_vm0 = vmpackc.low %vm1161_vm3, %vm1190_vm10 }
 0x1f9   : > { %v1025_v44 = vpop.permute.xlu1 %1024  ;;  %v1020_v45 = vpop.permute.xlu0 %1019  ;;  %v929_v46 = vpack.c.bf16 %v573_v41, %v553_v39  ;;  %v932_v47 = vpack.c.bf16 %v572_v43, %v552_v42  ;;  %vm1371_vm2 = vcmask 1039360   ;;  %vm1374_vm3 = vmmov %vm1373_vm1 }
 0x1fa   : > { %v1027_v48 = vunpack.i.h.bf16 %v1025_v44  ;;  %v1026_v49 = vunpack.i.l.bf16 %v1025_v44  ;;  %v1022_v50 = vunpack.i.h.bf16 %v1020_v45  ;;  %v1021_v51 = vunpack.i.l.bf16 %v1020_v45 }
 0x1fb   : > { %931 = vmatprep.subr.msk.bf16.mxu1 %vm1170_vm6, %v929_v46 }
 0x1fc   : > { %v610_v52 = vsel %vm337_vm4, %v605_v30, %v1026_v49  ;;  %v611_v53 = vsel %vm337_vm4, %v1026_v49, %v1027_v48  ;;  %v590_v54 = vsel %vm316_vm8, %v585_v31, %v1021_v51  ;;  %v591_v56 = vsel %vm316_vm8, %v1021_v51, %v1022_v50  ;;  %934 = vmatpush1.bf16.msk.msra.mxu1 %vm1179_vm7, %v932_v47  ;;  %vm1372_vm4 = vmmov %vm1371_vm2 }
 0x1fd   : > { %v935_v57 = vpack.c.bf16 %v611_v53, %v591_v56  ;;  %v938_v58 = vpack.c.bf16 %v610_v52, %v590_v54  ;;  %v629_v60 = vpop.permute.xlu1 %628  ;;  %v649_v61 = vpop.permute.xlu0 %648 }
 0x1ff   : > { %937 = vmatprep.subr.msk.bf16.mxu1 %vm912_vm11, %v935_v57 }
 0x200   : > { %940 = vmatpush1.bf16.msk.msra.mxu1 %vm1370_vm0, %v938_v58 }
 0x201   : > { %v1040_v62 = vpop.permute.xlu1 %1039  ;;  %v1030_v63 = vpop.permute.xlu0 %1029 }
 0x202   : > { %v1032_v3 = vunpack.i.h.bf16 %v1030_v63  ;;  %v1031_v4 = vunpack.i.l.bf16 %v1030_v63  ;;  %v1042_v5 = vunpack.i.h.bf16 %v1040_v62  ;;  %v1041_v6 = vunpack.i.l.bf16 %v1040_v62 }
 0x204   : > { %v634_v7 = vsel %vm1371_vm2, %v629_v60, %v1031_v4  ;;  %v635_v19 = vsel %vm1372_vm4, %v1031_v4, %v1032_v3  ;;  %v675_v13 = vsel %vm404_vm14, %v1041_v6, %v1042_v5 }
 0x205   : > { %v941_v8 = vpack.c.bf16 %v635_v19, %v1259_v23  ;;  %v944_v9 = vpack.c.bf16 %v634_v7, %v1257_v22  ;;  %v669_v10 = vpop.permute.xlu1 %668  ;;  %v1035_v20 = vpop.permute.xlu0 %1034 }
 0x206   : > { %v1037_v11 = vunpack.i.h.bf16 %v1035_v20  ;;  %v1036_v12 = vunpack.i.l.bf16 %v1035_v20  ;;  %v674_v14 = vsel %vm404_vm14, %v669_v10, %v1041_v6 }
 0x207   : > { %943 = vmatprep.subr.msk.bf16.mxu1 %vm1222_vm15, %v941_v8 }
 0x208   : > { %v654_v15 = vsel %vm1373_vm1, %v649_v61, %v1036_v12  ;;  %v655_v16 = vsel %vm1374_vm3, %v1036_v12, %v1037_v11  ;;  %946 = vmatpush1.bf16.msk.msra.mxu1 %vm1231_vm12, %v944_v9 }
 0x209   : > { %v947_v17 = vpack.c.bf16 %v675_v13, %v655_v16  ;;  %v950_v18 = vpack.c.bf16 %v674_v14, %v654_v15  ;;  %v691_v21 = vpop.permute.xlu1 %690  ;;  %v689_v22 = vpop.permute.xlu0 %688 }
 0x20a   : > { %v693_v55 = vsel %vm423_vm5, %v689_v22, %v691_v21 }
 0x20b   : > { %949 = vmatprep.subr.msk.bf16.mxu1 %vm1170_vm6, %v947_v17 }
 0x20c   : > { %952 = vmatpush1.bf16.msk.msra.mxu1 %vm1179_vm7, %v950_v18 }
 0x20d   : > { %v687_v23 = vpop.permute.xlu0 %686  ;;  %903 = vmatprep.subr.msk.mxu1 %vm1183_vm9, %v693_v55 }
 0x20e   : > { %v692_v59 = vsel %vm423_vm5, %v687_v23, %v689_v22 }
 0x210   : > { %904 = vmatpush1.msk.msra.mxu1 %vm1190_vm10, %v692_v59 }
 0x211   : > { %876 = vmatmul.mubr.msk.f32.vlgmr.msra.gmra.mrb[0].mxu1 %vm457_vm13, %v700_v24 }
 0x21a   : > { %v723_v28 = vpop.permute.xlu1 %722 }
 0x2e4   : > { %v794_v25 = vpop.f32.mrb[0].mxu1 }
 0x2e5   : > { %v795_v26 = vadd.f32 %v794_v25, %v723_v28  ;;  %v796_v34 = vpop.f32.mrb[1].mxu1 }
 0x2e6   : > { %v797_v27 = vadd.f32 %v796_v34, %v723_v28 }
 0x2e7   : > { %v805_v29 = vadd.f32 %v795_v26, %v1115_v1 }
 0x2e8   : > { %v806_v35 = vadd.f32 %v797_v27, %v1117_v2 }
 0x2e9   : > { %v807_v30 = vmax.f32 %v805_v29, 0.0 }
 0x2ea   : > { %v808_v31 = vmax.f32 %v806_v35, 0.0 }
 0x2eb   : > { %809 = vst [vmem:[%s224_s17] sm:$0xff] %v807_v30 }
 0x2ec   : > { %810 = vst [vmem:[%s224_s17 + $0x8] sm:$0xff] %v808_v31 }
 0x2ed PF: > { %s15_s18 = sadd.s32 1, %s1050_s18  }
 0x2ee   : > { %p12_p4 = scmp.ge.s32.totalorder %s15_s18, 4  }
 0x2f0   :  { %14 = sbr.rel (!%p12_p4) target bundleno = 1 (0x1), region = 70 }

</bundles_post_ra>
